<compile_context>
chip_gen: v7x
topology: tpu7x:2x2x1
jax: 0.10.0
libtpu: 0.0.40
codegen_flags: <defaults>
</compile_context>

<pallas_src>
import jax
import jax.numpy as jnp
from jax.experimental import pallas as pl
from jax.experimental.pallas import tpu as pltpu


def dqn_mlp_kernel(x_ref,
                   w1_ref, b1_ref,
                   w2_ref, b2_ref,
                   w3_ref, b3_ref,
                   w4_ref, b4_ref,
                   w5_ref, b5_ref,
                   out_ref):
    """Fused 5-layer MLP with Tanh activations for one batch tile.

    Weights/biases are full-extent VMEM blocks (resident across grid steps),
    activations stay in registers/VMEM between layers, so all five matmuls hit
    the MXU back-to-back with no HBM round-trips inside the kernel.
    """

    def dense(h, w_ref, b_ref):
        # Cast the activation to the weight dtype (bf16) for the MXU, keep
        # f32 accumulation and do the bias add / tanh in f32 on the VPU/EUP.
        return jnp.dot(h.astype(w_ref.dtype), w_ref[...],
                       preferred_element_type=jnp.float32) + b_ref[...]

    h = x_ref[...]
    h = jnp.tanh(dense(h, w1_ref, b1_ref))
    h = jnp.tanh(dense(h, w2_ref, b2_ref))
    h = jnp.tanh(dense(h, w3_ref, b3_ref))
    h = jnp.tanh(dense(h, w4_ref, b4_ref))
    out_ref[...] = dense(h, w5_ref, b5_ref).astype(out_ref.dtype)


def _round_up(x, m):
    return ((x + m - 1) // m) * m


def dqn_forward(x, params, *, block_b=512):
    """x: (B, n_input) float32.  params: list of (W, b) with W:(in,out) bf16
    (or f32), b:(1,out) f32.  Returns (B, n_output) float32 q-values.

    Handles arbitrary B (pads to a sublane/tile multiple); for best MXU
    occupancy callers should batch states so B >= 128.
    """
    B, n_in = x.shape
    n_out = params[-1][1].shape[-1]

    # --- pad the final layer's output features to a lane multiple (>=128) so
    # the output store is lane-dense; extra zero columns are sliced off below.
    n_out_p = max(128, _round_up(n_out, 128))
    w5, b5 = params[-1]
    if n_out_p != n_out:
        w5 = jnp.pad(w5, ((0, 0), (0, n_out_p - n_out)))
        b5 = jnp.pad(b5, ((0, 0), (0, n_out_p - n_out)))
    layers = list(params[:-1]) + [(w5, b5)]

    # --- pad batch to a sublane multiple and choose the batch tile.
    b_pad = _round_up(B, 8)
    tb = min(block_b, b_pad)
    b_pad = _round_up(b_pad, tb)
    if b_pad != B:
        x = jnp.pad(x, ((0, b_pad - B), (0, 0)))
    grid = (b_pad // tb,)

    flat_args = [x]
    for w, b in layers:
        flat_args.append(w)
        flat_args.append(b)

    def resident_spec(arr):
        # Full-extent block whose index_map is constant across the batch grid
        # axis -> weights/biases stay VMEM-resident, no re-DMA per tile.
        return pl.BlockSpec(arr.shape, lambda i: (0, 0))

    in_specs = [pl.BlockSpec((tb, n_in), lambda i: (i, 0))]
    for w, b in layers:
        in_specs.append(resident_spec(w))
        in_specs.append(resident_spec(b))
    out_spec = pl.BlockSpec((tb, n_out_p), lambda i: (i, 0))

    # Advisory cost estimate so XLA can schedule around this small kernel.
    dims = [n_in] + [w.shape[1] for w, _ in layers]
    flops = 2 * b_pad * sum(dims[i] * dims[i + 1] for i in range(len(dims) - 1))
    transcendentals = b_pad * sum(dims[1:-1])          # tanh on hidden layers
    bytes_accessed = (x.size * x.dtype.itemsize
                      + sum(w.size * w.dtype.itemsize + b.size * b.dtype.itemsize
                            for w, b in layers)
                      + b_pad * n_out_p * 4)

    out = pl.pallas_call(
        dqn_mlp_kernel,
        out_shape=jax.ShapeDtypeStruct((b_pad, n_out_p), jnp.float32),
        grid=grid,
        in_specs=in_specs,
        out_specs=out_spec,
        compiler_params=pltpu.CompilerParams(
            dimension_semantics=("parallel",)),
        cost_estimate=pl.CostEstimate(
            flops=int(flops),
            transcendentals=int(transcendentals),
            bytes_accessed=int(bytes_accessed)),
    )(*flat_args)

    return out[:B, :n_out]


def init_dqn_params(key, n_input, n_output, weight_dtype=jnp.bfloat16):
    """Deterministic init mimicking nn.Linear default (uniform +/- 1/sqrt(fan_in)).
    Weights returned transposed to (in, out) and cast to `weight_dtype`
    (bf16 halves HBM traffic and uses the native MXU path); biases stay f32."""
    dims = [n_input, 128, 256, 256, 128, n_output]
    params = []
    for i in range(len(dims) - 1):
        fan_in, fan_out = dims[i], dims[i + 1]
        key, kw, kb = jax.random.split(key, 3)
        bound = 1.0 / jnp.sqrt(jnp.float32(fan_in))
        w = jax.random.uniform(kw, (fan_in, fan_out), jnp.float32,
                               minval=-bound, maxval=bound).astype(weight_dtype)
        b = jax.random.uniform(kb, (1, fan_out), jnp.float32,
                               minval=-bound, maxval=bound)
        params.append((w, b))
    return params


def dqn_forward_ref(x, params):
    """Pure-JAX reference using the same dtype pipeline (bf16 weights,
    f32 accumulation / bias / tanh) for correctness checking."""
    h = x
    for i, (w, b) in enumerate(params):
        h = jnp.dot(h.astype(w.dtype), w,
                    preferred_element_type=jnp.float32) + b
        if i < len(params) - 1:
            h = jnp.tanh(h)
    return h


if __name__ == "__main__":
    key = jax.random.PRNGKey(0)
    n_input, n_output, batch = 16, 4, 8

    kx, kp = jax.random.split(key)
    x = jax.random.normal(kx, (batch, n_input), dtype=jnp.float32)
    params = init_dqn_params(kp, n_input, n_output)

    q = dqn_forward(x, params)
    q = jax.block_until_ready(q)

    q_ref = dqn_forward_ref(x, params)
    assert q.shape == (batch, n_output)
    assert jnp.allclose(q, q_ref, atol=2e-4, rtol=2e-4), "mismatch vs reference"

    print("KERNEL_OK")
</pallas_src>

<mosaic_0001>
module attributes {stable_mosaic.version = 11 : i64} {
  func.func @dqn_mlp_kernel(%arg0: i32, %arg1: memref<8x16xf32, #tpu.memory_space<vmem>>, %arg2: memref<16x128xbf16, #tpu.memory_space<vmem>>, %arg3: memref<1x128xf32, #tpu.memory_space<vmem>>, %arg4: memref<128x256xbf16, #tpu.memory_space<vmem>>, %arg5: memref<1x256xf32, #tpu.memory_space<vmem>>, %arg6: memref<256x256xbf16, #tpu.memory_space<vmem>>, %arg7: memref<1x256xf32, #tpu.memory_space<vmem>>, %arg8: memref<256x128xbf16, #tpu.memory_space<vmem>>, %arg9: memref<1x128xf32, #tpu.memory_space<vmem>>, %arg10: memref<128x128xbf16, #tpu.memory_space<vmem>>, %arg11: memref<1x128xf32, #tpu.memory_space<vmem>>, %arg12: memref<8x128xf32, #tpu.memory_space<vmem>>) attributes {dimension_semantics = [#tpu.dimension_semantics<parallel>], iteration_bounds = array<i64: 1>, scalar_prefetch = 0 : i64, scratch_operands = 0 : i64, tpu.core_type = #tpu.core_type<tc>, window_params = [{transform_indices = @transform_0, window_bounds = array<i64: 8, 16>}, {pipeline_mode = #tpu.pipeline_mode<synchronous>, transform_indices = @transform_1, window_bounds = array<i64: 16, 128>}, {pipeline_mode = #tpu.pipeline_mode<synchronous>, transform_indices = @transform_2, window_bounds = array<i64: 1, 128>}, {pipeline_mode = #tpu.pipeline_mode<synchronous>, transform_indices = @transform_3, window_bounds = array<i64: 128, 256>}, {pipeline_mode = #tpu.pipeline_mode<synchronous>, transform_indices = @transform_4, window_bounds = array<i64: 1, 256>}, {pipeline_mode = #tpu.pipeline_mode<synchronous>, transform_indices = @transform_5, window_bounds = array<i64: 256, 256>}, {pipeline_mode = #tpu.pipeline_mode<synchronous>, transform_indices = @transform_6, window_bounds = array<i64: 1, 256>}, {pipeline_mode = #tpu.pipeline_mode<synchronous>, transform_indices = @transform_7, window_bounds = array<i64: 256, 128>}, {pipeline_mode = #tpu.pipeline_mode<synchronous>, transform_indices = @transform_8, window_bounds = array<i64: 1, 128>}, {pipeline_mode = #tpu.pipeline_mode<synchronous>, transform_indices = @transform_9, window_bounds = array<i64: 128, 128>}, {pipeline_mode = #tpu.pipeline_mode<synchronous>, transform_indices = @transform_10, window_bounds = array<i64: 1, 128>}, {transform_indices = @transform_11, window_bounds = array<i64: 8, 128>}]} {
    %c0 = arith.constant 0 : index
    %c0_0 = arith.constant 0 : index
    %0 = vector.load %arg1[%c0, %c0_0] : memref<8x16xf32, #tpu.memory_space<vmem>>, vector<8x16xf32>
    %1 = arith.truncf %0 : vector<8x16xf32> to vector<8x16xbf16>
    %c0_1 = arith.constant 0 : index
    %c0_2 = arith.constant 0 : index
    %2 = vector.load %arg2[%c0_1, %c0_2] : memref<16x128xbf16, #tpu.memory_space<vmem>>, vector<16x128xbf16>
    %cst = arith.constant dense<0.000000e+00> : vector<8x128xf32>
    %3 = tpu.matmul %1, %2, %cst {dimension_numbers = #tpu.dot_dimension_numbers<[1], [0], [0], [1], [0, 0, 1, 1], [], []>} : vector<8x16xbf16>, vector<16x128xbf16>, vector<8x128xf32> -> vector<8x128xf32>
    %c0_3 = arith.constant 0 : index
    %c0_4 = arith.constant 0 : index
    %4 = vector.load %arg3[%c0_3, %c0_4] : memref<1x128xf32, #tpu.memory_space<vmem>>, vector<1x128xf32>
    %5 = vector.broadcast %4 : vector<1x128xf32> to vector<8x128xf32>
    %6 = arith.addf %3, %5 : vector<8x128xf32>
    %7 = math.tanh %6 : vector<8x128xf32>
    %8 = arith.truncf %7 : vector<8x128xf32> to vector<8x128xbf16>
    %c0_5 = arith.constant 0 : index
    %c0_6 = arith.constant 0 : index
    %9 = vector.load %arg4[%c0_5, %c0_6] : memref<128x256xbf16, #tpu.memory_space<vmem>>, vector<128x256xbf16>
    %cst_7 = arith.constant dense<0.000000e+00> : vector<8x256xf32>
    %10 = tpu.matmul %8, %9, %cst_7 {dimension_numbers = #tpu.dot_dimension_numbers<[1], [0], [0], [1], [0, 0, 1, 1], [], []>} : vector<8x128xbf16>, vector<128x256xbf16>, vector<8x256xf32> -> vector<8x256xf32>
    %c0_8 = arith.constant 0 : index
    %c0_9 = arith.constant 0 : index
    %11 = vector.load %arg5[%c0_8, %c0_9] : memref<1x256xf32, #tpu.memory_space<vmem>>, vector<1x256xf32>
    %12 = vector.broadcast %11 : vector<1x256xf32> to vector<8x256xf32>
    %13 = arith.addf %10, %12 : vector<8x256xf32>
    %14 = math.tanh %13 : vector<8x256xf32>
    %15 = arith.truncf %14 : vector<8x256xf32> to vector<8x256xbf16>
    %c0_10 = arith.constant 0 : index
    %c0_11 = arith.constant 0 : index
    %16 = vector.load %arg6[%c0_10, %c0_11] : memref<256x256xbf16, #tpu.memory_space<vmem>>, vector<256x256xbf16>
    %cst_12 = arith.constant dense<0.000000e+00> : vector<8x256xf32>
    %17 = tpu.matmul %15, %16, %cst_12 {dimension_numbers = #tpu.dot_dimension_numbers<[1], [0], [0], [1], [0, 0, 1, 1], [], []>} : vector<8x256xbf16>, vector<256x256xbf16>, vector<8x256xf32> -> vector<8x256xf32>
    %c0_13 = arith.constant 0 : index
    %c0_14 = arith.constant 0 : index
    %18 = vector.load %arg7[%c0_13, %c0_14] : memref<1x256xf32, #tpu.memory_space<vmem>>, vector<1x256xf32>
    %19 = vector.broadcast %18 : vector<1x256xf32> to vector<8x256xf32>
    %20 = arith.addf %17, %19 : vector<8x256xf32>
    %21 = math.tanh %20 : vector<8x256xf32>
    %22 = arith.truncf %21 : vector<8x256xf32> to vector<8x256xbf16>
    %c0_15 = arith.constant 0 : index
    %c0_16 = arith.constant 0 : index
    %23 = vector.load %arg8[%c0_15, %c0_16] : memref<256x128xbf16, #tpu.memory_space<vmem>>, vector<256x128xbf16>
    %cst_17 = arith.constant dense<0.000000e+00> : vector<8x128xf32>
    %24 = tpu.matmul %22, %23, %cst_17 {dimension_numbers = #tpu.dot_dimension_numbers<[1], [0], [0], [1], [0, 0, 1, 1], [], []>} : vector<8x256xbf16>, vector<256x128xbf16>, vector<8x128xf32> -> vector<8x128xf32>
    %c0_18 = arith.constant 0 : index
    %c0_19 = arith.constant 0 : index
    %25 = vector.load %arg9[%c0_18, %c0_19] : memref<1x128xf32, #tpu.memory_space<vmem>>, vector<1x128xf32>
    %26 = vector.broadcast %25 : vector<1x128xf32> to vector<8x128xf32>
    %27 = arith.addf %24, %26 : vector<8x128xf32>
    %28 = math.tanh %27 : vector<8x128xf32>
    %29 = arith.truncf %28 : vector<8x128xf32> to vector<8x128xbf16>
    %c0_20 = arith.constant 0 : index
    %c0_21 = arith.constant 0 : index
    %30 = vector.load %arg10[%c0_20, %c0_21] : memref<128x128xbf16, #tpu.memory_space<vmem>>, vector<128x128xbf16>
    %cst_22 = arith.constant dense<0.000000e+00> : vector<8x128xf32>
    %31 = tpu.matmul %29, %30, %cst_22 {dimension_numbers = #tpu.dot_dimension_numbers<[1], [0], [0], [1], [0, 0, 1, 1], [], []>} : vector<8x128xbf16>, vector<128x128xbf16>, vector<8x128xf32> -> vector<8x128xf32>
    %c0_23 = arith.constant 0 : index
    %c0_24 = arith.constant 0 : index
    %32 = vector.load %arg11[%c0_23, %c0_24] : memref<1x128xf32, #tpu.memory_space<vmem>>, vector<1x128xf32>
    %33 = vector.broadcast %32 : vector<1x128xf32> to vector<8x128xf32>
    %34 = arith.addf %31, %33 : vector<8x128xf32>
    %c0_25 = arith.constant 0 : index
    %c0_26 = arith.constant 0 : index
    %35 = vector.load %arg12[%c0_25, %c0_26] : memref<8x128xf32, #tpu.memory_space<vmem>>, vector<8x128xf32>
    tpu.vector_store %arg12[%c0_25, %c0_26], %34 {strides = array<i32>} : memref<8x128xf32, #tpu.memory_space<vmem>>, vector<8x128xf32>,
    return
  }
  func.func @transform_0(%arg0: i32) -> (i32, i32) {
    %c0_i32 = arith.constant 0 : i32
    %c0_i32_0 = arith.constant 0 : i32
    return %arg0, %c0_i32 : i32, i32
  }
  func.func @transform_1(%arg0: i32) -> (i32, i32) {
    %c0_i32 = arith.constant 0 : i32
    %c0_i32_0 = arith.constant 0 : i32
    %c0_i32_1 = arith.constant 0 : i32
    return %c0_i32, %c0_i32_0 : i32, i32
  }
  func.func @transform_2(%arg0: i32) -> (i32, i32) {
    %c0_i32 = arith.constant 0 : i32
    %c0_i32_0 = arith.constant 0 : i32
    %c0_i32_1 = arith.constant 0 : i32
    return %c0_i32, %c0_i32_0 : i32, i32
  }
  func.func @transform_3(%arg0: i32) -> (i32, i32) {
    %c0_i32 = arith.constant 0 : i32
    %c0_i32_0 = arith.constant 0 : i32
    %c0_i32_1 = arith.constant 0 : i32
    return %c0_i32, %c0_i32_0 : i32, i32
  }
  func.func @transform_4(%arg0: i32) -> (i32, i32) {
    %c0_i32 = arith.constant 0 : i32
    %c0_i32_0 = arith.constant 0 : i32
    %c0_i32_1 = arith.constant 0 : i32
    return %c0_i32, %c0_i32_0 : i32, i32
  }
  func.func @transform_5(%arg0: i32) -> (i32, i32) {
    %c0_i32 = arith.constant 0 : i32
    %c0_i32_0 = arith.constant 0 : i32
    %c0_i32_1 = arith.constant 0 : i32
    return %c0_i32, %c0_i32_0 : i32, i32
  }
  func.func @transform_6(%arg0: i32) -> (i32, i32) {
    %c0_i32 = arith.constant 0 : i32
    %c0_i32_0 = arith.constant 0 : i32
    %c0_i32_1 = arith.constant 0 : i32
    return %c0_i32, %c0_i32_0 : i32, i32
  }
  func.func @transform_7(%arg0: i32) -> (i32, i32) {
    %c0_i32 = arith.constant 0 : i32
    %c0_i32_0 = arith.constant 0 : i32
    %c0_i32_1 = arith.constant 0 : i32
    return %c0_i32, %c0_i32_0 : i32, i32
  }
  func.func @transform_8(%arg0: i32) -> (i32, i32) {
    %c0_i32 = arith.constant 0 : i32
    %c0_i32_0 = arith.constant 0 : i32
    %c0_i32_1 = arith.constant 0 : i32
    return %c0_i32, %c0_i32_0 : i32, i32
  }
  func.func @transform_9(%arg0: i32) -> (i32, i32) {
    %c0_i32 = arith.constant 0 : i32
    %c0_i32_0 = arith.constant 0 : i32
    %c0_i32_1 = arith.constant 0 : i32
    return %c0_i32, %c0_i32_0 : i32, i32
  }
  func.func @transform_10(%arg0: i32) -> (i32, i32) {
    %c0_i32 = arith.constant 0 : i32
    %c0_i32_0 = arith.constant 0 : i32
    %c0_i32_1 = arith.constant 0 : i32
    return %c0_i32, %c0_i32_0 : i32, i32
  }
  func.func @transform_11(%arg0: i32) -> (i32, i32) {
    %c0_i32 = arith.constant 0 : i32
    %c0_i32_0 = arith.constant 0 : i32
    return %arg0, %c0_i32 : i32, i32
  }
}

</mosaic_0001>

<bundles_post_ra>
// kernel: tpu_custom_call.1
= control target key start
LH: loop header
LB: loop body
LE: loop exit
PB: predicated region body
PF: predicated region fallthrough
CT: control target
= control target key end

     0   :  { %16 = vsyncpa [#allocation3], 0  ;;  %s1516_s0 = inlined_call_operand.hbm [shape: f32[8,16], index: 0, kind: input, shape index: {}]   ;;  %s1517_s1 = inlined_call_operand.hbm [shape: bf16[16,128], index: 1, kind: input, shape index: {}]   ;;  %s1518_s2 = inlined_call_operand.vmem [shape: f32[1,128], index: 2, kind: input, shape index: {}]   ;;  %s1519_s3 = inlined_call_operand.hbm [shape: bf16[128,256], index: 3, kind: input, shape index: {}]   ;;  %s1520_s4 = inlined_call_operand.vmem [shape: f32[1,256], index: 4, kind: input, shape index: {}]   ;;  %s1521_s5 = inlined_call_operand.hbm [shape: bf16[256,256], index: 5, kind: input, shape index: {}]   ;;  %s1522_s6 = inlined_call_operand.vmem [shape: f32[1,256], index: 6, kind: input, shape index: {}]   ;;  %s1523_s7 = inlined_call_operand.hbm [shape: bf16[256,128], index: 7, kind: input, shape index: {}]   ;;  %s1524_s8 = inlined_call_operand.vmem [shape: f32[1,128], index: 8, kind: input, shape index: {}]   ;;  %s1525_s9 = inlined_call_operand.hbm [shape: bf16[128,128], index: 9, kind: input, shape index: {}]   ;;  %s1526_s10 = inlined_call_operand.vmem [shape: f32[1,128], index: 10, kind: input, shape index: {}]   ;;  %s1527_s11 = inlined_call_operand.hbm [shape: f32[8,128], index: 11, kind: output, shape index: {}]  }
   0x1   :  { %17 = vsyncpa [#allocation6], 0 }
   0x2   :  { %18 = vsyncpa [#allocation9], 0 }
   0x3   :  { %19 = vsyncpa [#allocation12], 0 }
   0x4   :  { %20 = vsyncpa [#allocation4], 0  ;;  %s1315_s17 = smov [#allocation5]   ;;  %s1151_s21 = scalar_lea.hbm %s1517_s1, 128 }
   0x5   :  { %s36_s18 = sshll.u32 %s1315_s17, 4  ;;  %p1152_p0 = scmp.ne.s32.totalorder %s1517_s1, %s1151_s21  ;;  %s37_s18 = int_to_ptr.vmem [resolvable:$true] %s36_s18 }
   0x6   :  { %p1155_p1 = scmp.lt.u32.totalorder %s1151_s21, %s1517_s1 }
   0x8   :  { %p1157_p2 = pnand %p1155_p1, %p1152_p0 }
   0xa   :  { %1160 = shalt.err (!%p1157_p2)
}
   0xb   :  { %s1161_s26 = scalar_lea.vmem %s37_s18, 128  ;;  %p1166_p4 = scmp.lt.s32.totalorder %s37_s18, %s37_s18 }
   0xc   :  { %p1162_p3 = scmp.ne.s32.totalorder %s37_s18, %s1161_s26  ;;  %p1167_p5 = scmp.lt.s32.totalorder %s1161_s26, %s1161_s26 }
   0xe   :  { %p1168_p6 = por %p1167_p5, %p1166_p4 }
  0x10   :  { %p1169_p7 = pnand %p1168_p6, %p1162_p3 }
  0x12   :  { %1172 = shalt.err (!%p1169_p7)
}
  0x13   :  { %s1316_s27 = smov 64   ;;  %s1317_s28 = smov 4  }
  0x14   :  { %42 = dma.hbm_to_vmem [thread:$0]  %s1517_s1, 128, %s37_s18, [#allocation6], %s1316_s27, %s1316_s27, %s1317_s28  }
  0x15   :  { %s1318_s12 = smov [#allocation8]   ;;  %s1319_s14 = smov [#allocation2]  }
  0x16   :  { %s64_s13 = sshll.u32 %s1318_s12, 4  ;;  %s27_s15 = sshll.u32 %s1319_s14, 4  ;;  %s65_s13 = int_to_ptr.vmem [resolvable:$true] %s64_s13  ;;  %s28_s15 = int_to_ptr.vmem [resolvable:$true] %s27_s15 }
  0x17   :  { %s1173_s19 = scalar_lea.hbm %s1521_s5, 4096 }
  0x18   :  { %p1174_p8 = scmp.ne.s32.totalorder %s1521_s5, %s1173_s19  ;;  %p1177_p9 = scmp.lt.u32.totalorder %s1173_s19, %s1521_s5 }
  0x1a   :  { %p1179_p10 = pnand %p1177_p9, %p1174_p8 }
  0x1c   :  { %1182 = shalt.err (!%p1179_p10)
}
  0x1d   :  { %s1183_s1 = scalar_lea.vmem %s65_s13, 4096  ;;  %p1188_p12 = scmp.lt.s32.totalorder %s65_s13, %s65_s13 }
  0x1e   :  { %p1184_p11 = scmp.ne.s32.totalorder %s65_s13, %s1183_s1  ;;  %p1189_p13 = scmp.lt.s32.totalorder %s1183_s1, %s1183_s1 }
  0x20   :  { %p1190_p0 = por %p1189_p13, %p1188_p12 }
  0x22   :  { %p1191_p1 = pnand %p1190_p0, %p1184_p11 }
  0x24   :  { %1194 = shalt.err (!%p1191_p1)
}
  0x25   :  { %s1320_s18 = smov 128   ;;  %s1321_s24 = smov 8  }
  0x26   :  { %70 = dma.hbm_to_vmem [thread:$0]  %s1521_s5, 4096, %s65_s13, [#allocation9], %s1320_s18, %s1320_s18, %s1321_s24  }
  0x27   :  { %s1195_s12 = scalar_lea.hbm %s1516_s0, 128 }
  0x28   :  { %p1196_p2 = scmp.ne.s32.totalorder %s1516_s0, %s1195_s12  ;;  %p1199_p3 = scmp.lt.u32.totalorder %s1195_s12, %s1516_s0 }
  0x2a   :  { %p1201_p4 = pnand %p1199_p3, %p1196_p2 }
  0x2c   :  { %1204 = shalt.err (!%p1201_p4)
}
  0x2d   :  { %s1205_s20 = scalar_lea.vmem %s28_s15, 128  ;;  %p1210_p6 = scmp.lt.s32.totalorder %s28_s15, %s28_s15 }
  0x2e   :  { %p1206_p5 = scmp.ne.s32.totalorder %s28_s15, %s1205_s20  ;;  %p1211_p7 = scmp.lt.s32.totalorder %s1205_s20, %s1205_s20 }
  0x30   :  { %p1212_p8 = por %p1211_p7, %p1210_p6 }
  0x32   :  { %p1213_p9 = pnand %p1212_p8, %p1206_p5 }
  0x34   :  { %1216 = shalt.err (!%p1213_p9)
}
  0x35   :  { %30 = dma.hbm_to_vmem [thread:$0]  %s1516_s0, 128, %s28_s15, [#allocation3]  }
  0x36   :  { %s1322_s21 = smov [#allocation7]   ;;  %s1323_s23 = smov [#allocation10]  }
  0x37   :  { %s50_s22 = sshll.u32 %s1322_s21, 4  ;;  %s78_s1 = sshll.u32 %s1323_s23, 4  ;;  %s51_s22 = int_to_ptr.vmem [resolvable:$true] %s50_s22  ;;  %s79_s1 = int_to_ptr.vmem [resolvable:$true] %s78_s1 }
  0x38   :  { %s1217_s29 = scalar_lea.hbm %s1519_s3, 2048 }
  0x39   :  { %p1218_p10 = scmp.ne.s32.totalorder %s1519_s3, %s1217_s29  ;;  %p1221_p11 = scmp.lt.u32.totalorder %s1217_s29, %s1519_s3 }
  0x3b   :  { %p1223_p12 = pnand %p1221_p11, %p1218_p10 }
  0x3d   :  { %1226 = shalt.err (!%p1223_p12)
}
  0x3e   :  { %s1227_s0 = scalar_lea.vmem %s51_s22, 2048  ;;  %p1232_p0 = scmp.lt.s32.totalorder %s51_s22, %s51_s22 }
  0x3f   :  { %p1228_p13 = scmp.ne.s32.totalorder %s51_s22, %s1227_s0  ;;  %p1233_p1 = scmp.lt.s32.totalorder %s1227_s0, %s1227_s0 }
  0x41   :  { %p1234_p2 = por %p1233_p1, %p1232_p0 }
  0x43   :  { %p1235_p3 = pnand %p1234_p2, %p1228_p13 }
  0x45   :  { %1238 = shalt.err (!%p1235_p3)
}
  0x46   :  { %56 = dma.hbm_to_vmem [thread:$0]  %s1519_s3, 2048, %s51_s22, [#allocation6], %s1320_s18, %s1320_s18, %s1321_s24  }
  0x47   :  { %s1239_s5 = scalar_lea.hbm %s1523_s7, 2048 }
  0x48   :  { %p1240_p4 = scmp.ne.s32.totalorder %s1523_s7, %s1239_s5  ;;  %p1243_p5 = scmp.lt.u32.totalorder %s1239_s5, %s1523_s7 }
  0x4a   :  { %p1245_p6 = pnand %p1243_p5, %p1240_p4 }
  0x4c   :  { %1248 = shalt.err (!%p1245_p6)
}
  0x4d   :  { %s1249_s26 = scalar_lea.vmem %s79_s1, 2048  ;;  %p1254_p8 = scmp.lt.s32.totalorder %s79_s1, %s79_s1 }
  0x4e   :  { %p1250_p7 = scmp.ne.s32.totalorder %s79_s1, %s1249_s26  ;;  %p1255_p9 = scmp.lt.s32.totalorder %s1249_s26, %s1249_s26 }
  0x50   :  { %p1256_p10 = por %p1255_p9, %p1254_p8 }
  0x52   :  { %p1257_p11 = pnand %p1256_p10, %p1250_p7 }
  0x54   :  { %1260 = shalt.err (!%p1257_p11)
}
  0x55   :  { %84 = dma.hbm_to_vmem [thread:$0]  %s1523_s7, 2048, %s79_s1, [#allocation9], %s1316_s27, %s1316_s27, %s1317_s28  }
  0x56   :  { %s1324_s24 = smov [#allocation11]   ;;  %s1261_s12 = scalar_lea.hbm %s1525_s9, 1024 }
  0x57   :  { %s92_s22 = sshll.u32 %s1324_s24, 4  ;;  %p1262_p12 = scmp.ne.s32.totalorder %s1525_s9, %s1261_s12  ;;  %s93_s22 = int_to_ptr.vmem [resolvable:$true] %s92_s22 }
  0x58   :  { %p1265_p13 = scmp.lt.u32.totalorder %s1261_s12, %s1525_s9 }
  0x5a   :  { %p1267_p0 = pnand %p1265_p13, %p1262_p12 }
  0x5c   :  { %1270 = shalt.err (!%p1267_p0)
}
  0x5d   :  { %s1271_s17 = scalar_lea.vmem %s93_s22, 1024  ;;  %p1276_p2 = scmp.lt.s32.totalorder %s93_s22, %s93_s22 }
  0x5e   :  { %p1272_p1 = scmp.ne.s32.totalorder %s93_s22, %s1271_s17  ;;  %p1277_p3 = scmp.lt.s32.totalorder %s1271_s17, %s1271_s17 }
  0x60   :  { %p1278_p4 = por %p1277_p3, %p1276_p2 }
  0x62   :  { %p1279_p5 = pnand %p1278_p4, %p1272_p1 }
  0x64   :  { %1282 = shalt.err (!%p1279_p5)
}
  0x65   :  { %98 = dma.hbm_to_vmem [thread:$0]  %s1525_s9, 1024, %s93_s22, [#allocation12], %s1316_s27, %s1316_s27, %s1317_s28  }
  0x66   :  { %1305 = dma.done.wait [#allocation3], 128  }
  0x67   :  { %1306 = vsyncadd [#allocation3], 4294967168 }
  0x68   :  { %1307 = dma.done.wait [#allocation6], 2176  }
  0x69   :  { %1308 = vsyncadd [#allocation6], 4294965120 }
  0x6a   :  { %1309 = dma.done.wait [#allocation9], 6144  }
  0x6b   :  { %1310 = vsyncadd [#allocation9], 4294961152 }
  0x6c   :  { %1311 = dma.done.wait [#allocation12], 1024  }
  0x6d   :  { %1312 = vsyncadd [#allocation12], 4294966272  ;;  %v1325_v0 = vmov 0.0   ;;  %vm1326_vm0 = vmmov 0   ;;  %v1042_v1 = vld [vmem:[#allocation5] sm:$0xff]   ;;  %v120_v2 = vld [vmem:[#allocation2] sm:$0xff] }
  0x6e   :  { %1002 = vmatprep.subr.bf16.mxu0 %v1325_v0  ;;  %1004 = vmatprep.mubr.msk.bf16.mxu0 %vm1326_vm0, %v1325_v0  ;;  %v121_v3 = vpack.c.bf16 %v120_v2, %v120_v2  ;;  %vm137_vm1 = vcmask 130048   ;;  %v1043_v4 = vld [vmem:[#allocation7 + $0x4] ss:$8 sps:$4 sm:$0xff]   ;;  %v1045_v5 = vld [vmem:[#allocation7] ss:$8 sps:$4 sm:$0xff]   ;;  %v1327_v20 = vmov 0  }
  0x6f   :  { %1003 = vmatpush3.bf16.msra.mxu0 %v1042_v1  ;;  %v1046_v6 = vld [vmem:[#allocation7 + $0x14] ss:$8 sps:$4 sm:$0xff]   ;;  %291 = vmatprep.subr.bf16.mxu1 %v1043_v4  ;;  %v1048_v7 = vld [vmem:[#allocation7 + $0x10] ss:$8 sps:$4 sm:$0xff]   ;;  %v1049_v8 = vld [vmem:[#allocation7 + $0x24] ss:$8 sps:$4 sm:$0xff]  }
  0x70   :  { %292 = vmatpush1.bf16.msra.mxu1 %v1045_v5  ;;  %v1051_v9 = vld [vmem:[#allocation7 + $0x20] ss:$8 sps:$4 sm:$0xff]   ;;  %v1052_v10 = vld [vmem:[#allocation7 + $0x34] ss:$8 sps:$4 sm:$0xff]   ;;  %v1054_v11 = vld [vmem:[#allocation7 + $0x30] ss:$8 sps:$4 sm:$0xff]   ;;  %323 = vmatprep.mubr.bf16.mxu1 %v1327_v20 }
  0x71   :  { %293 = vmatprep.subr.bf16.mxu1 %v1046_v6  ;;  %v1055_v12 = vld [vmem:[#allocation7 + $0x44] ss:$8 sps:$4 sm:$0xff]   ;;  %v1057_v13 = vld [vmem:[#allocation7 + $0x40] ss:$8 sps:$4 sm:$0xff]   ;;  %v1058_v14 = vld [vmem:[#allocation7 + $0x54] ss:$8 sps:$4 sm:$0xff]   ;;  %v201_v6 = vlaneseq }
  0x72   :  { %1005 = vmatmul.mubr.msk.bf16.vlgmr.msra.gmra.mrb[0].mxu0 %vm137_vm1, %v121_v3  ;;  %v1060_v15 = vld [vmem:[#allocation7 + $0x50] ss:$8 sps:$4 sm:$0xff]   ;;  %v1061_v16 = vld [vmem:[#allocation7 + $0x64] ss:$8 sps:$4 sm:$0xff]   ;;  %v1063_v17 = vld [vmem:[#allocation7 + $0x60] ss:$8 sps:$4 sm:$0xff]  }
  0x73   :  { %v1064_v18 = vld [vmem:[#allocation7 + $0x74] ss:$8 sps:$4 sm:$0xff]   ;;  %v1066_v19 = vld [vmem:[#allocation7 + $0x70] ss:$8 sps:$4 sm:$0xff]   ;;  %v1067_v21 = vld [vmem:[#allocation8] ss:$8 sps:$4 sm:$0xff]  }
  0x74   :  { %294 = vmatpush1.bf16.msra.mxu1 %v1048_v7  ;;  %v1069_v22 = vld [vmem:[#allocation8 + $0x4] ss:$8 sps:$4 sm:$0xff]   ;;  %v1072_v23 = vld [vmem:[#allocation8 + $0x14] ss:$8 sps:$4 sm:$0xff]   ;;  %v1070_v24 = vld [vmem:[#allocation8 + $0x10] ss:$8 sps:$4 sm:$0xff]  }
  0x75   :  { %295 = vmatprep.subr.bf16.mxu1 %v1049_v8  ;;  %540 = vmatprep.subr.bf16.mxu0 %v1069_v22  ;;  %v1075_v25 = vld [vmem:[#allocation8 + $0x24] ss:$8 sps:$4 sm:$0xff]   ;;  %v1073_v26 = vld [vmem:[#allocation8 + $0x20] ss:$8 sps:$4 sm:$0xff]   ;;  %v1078_v27 = vld [vmem:[#allocation8 + $0x34] ss:$8 sps:$4 sm:$0xff]  }
  0x76   :  { %541 = vmatpush1.bf16.msra.mxu0 %v1067_v21  ;;  %v1076_v28 = vld [vmem:[#allocation8 + $0x30] ss:$8 sps:$4 sm:$0xff]   ;;  %v1081_v29 = vld [vmem:[#allocation8 + $0x44] ss:$8 sps:$4 sm:$0xff]   ;;  %v1079_v30 = vld [vmem:[#allocation8 + $0x40] ss:$8 sps:$4 sm:$0xff]  }
  0x77   :  { %542 = vmatprep.subr.bf16.mxu0 %v1072_v23  ;;  %v1084_v31 = vld [vmem:[#allocation8 + $0x54] ss:$8 sps:$4 sm:$0xff]   ;;  %v1082_v32 = vld [vmem:[#allocation8 + $0x50] ss:$8 sps:$4 sm:$0xff]   ;;  %v1087_v33 = vld [vmem:[#allocation8 + $0x64] ss:$8 sps:$4 sm:$0xff]  }
  0x78   :  { %296 = vmatpush1.bf16.msra.mxu1 %v1051_v9  ;;  %v1085_v34 = vld [vmem:[#allocation8 + $0x60] ss:$8 sps:$4 sm:$0xff]   ;;  %v1090_v35 = vld [vmem:[#allocation8 + $0x74] ss:$8 sps:$4 sm:$0xff]   ;;  %v1088_v36 = vld [vmem:[#allocation8 + $0x70] ss:$8 sps:$4 sm:$0xff]  }
  0x79   :  { %297 = vmatprep.subr.bf16.mxu1 %v1052_v10  ;;  %v1093_v37 = vld [vmem:[#allocation8 + $0x84] ss:$8 sps:$4 sm:$0xff]   ;;  %v1091_v38 = vld [vmem:[#allocation8 + $0x80] ss:$8 sps:$4 sm:$0xff]   ;;  %v1096_v39 = vld [vmem:[#allocation8 + $0x94] ss:$8 sps:$4 sm:$0xff]  }
  0x7a   :  { %543 = vmatpush1.bf16.msra.mxu0 %v1070_v24  ;;  %v1094_v40 = vld [vmem:[#allocation8 + $0x90] ss:$8 sps:$4 sm:$0xff]   ;;  %v1099_v41 = vld [vmem:[#allocation8 + $0xa4] ss:$8 sps:$4 sm:$0xff]   ;;  %v1097_v42 = vld [vmem:[#allocation8 + $0xa0] ss:$8 sps:$4 sm:$0xff]  }
  0x7b   :  { %544 = vmatprep.subr.bf16.mxu0 %v1075_v25  ;;  %v1102_v43 = vld [vmem:[#allocation8 + $0xb4] ss:$8 sps:$4 sm:$0xff]   ;;  %v1100_v44 = vld [vmem:[#allocation8 + $0xb0] ss:$8 sps:$4 sm:$0xff]   ;;  %v1105_v53 = vld [vmem:[#allocation8 + $0xc4] ss:$8 sps:$4 sm:$0xff]  }
  0x7c   :  { %298 = vmatpush1.bf16.msra.mxu1 %v1054_v11  ;;  %v892_v45 = vld [vmem:[%s1518_s2] ss:$0 sm:$0xff]  ;;  %v1103_v54 = vld [vmem:[#allocation8 + $0xc0] ss:$8 sps:$4 sm:$0xff]   ;;  %v1108_v55 = vld [vmem:[#allocation8 + $0xd4] ss:$8 sps:$4 sm:$0xff]  }
  0x7d   :  { %299 = vmatprep.subr.bf16.mxu1 %v1055_v12  ;;  %v1106_v56 = vld [vmem:[#allocation8 + $0xd0] ss:$8 sps:$4 sm:$0xff]   ;;  %v1111_v57 = vld [vmem:[#allocation8 + $0xe4] ss:$8 sps:$4 sm:$0xff]   ;;  %v1109_v58 = vld [vmem:[#allocation8 + $0xe0] ss:$8 sps:$4 sm:$0xff]  }
  0x7e   :  { %545 = vmatpush1.bf16.msra.mxu0 %v1073_v26  ;;  %v1114_v59 = vld [vmem:[#allocation8 + $0xf4] ss:$8 sps:$4 sm:$0xff]   ;;  %v1112_v60 = vld [vmem:[#allocation8 + $0xf0] ss:$8 sps:$4 sm:$0xff]   ;;  %v1115_v61 = vld [vmem:[#allocation10 + $0x40] sm:$0xff]   ;;  %v202_v7 = vshrl.u32 %v201_v6, 7 }
  0x7f   :  { %546 = vmatprep.subr.bf16.mxu0 %v1078_v27  ;;  %v1116_v62 = vld [vmem:[#allocation10] sm:$0xff]   ;;  %v1117_v63 = vld [vmem:[#allocation10 + $0x48] sm:$0xff]   ;;  %v1119_v2 = vld [vmem:[#allocation10 + $0x50] sm:$0xff]   ;;  %s1328_s21 = smov [#allocation13]  }
  0x80   :  { %300 = vmatpush1.bf16.msra.mxu1 %v1057_v13  ;;  %v1118_v1 = vld [vmem:[#allocation10 + $0x8] sm:$0xff]   ;;  %v1120_v3 = vld [vmem:[#allocation10 + $0x10] sm:$0xff]   ;;  %v1121_v4 = vld [vmem:[#allocation10 + $0x58] sm:$0xff]   ;;  %v203_v8 = vsub.s32 0, %v202_v7  ;;  %v207_v10 = vsub.s32 1, %v202_v7  ;;  %s880_s23 = sshll.u32 %s1328_s21, 4  ;;  %s881_s23 = int_to_ptr.vmem [resolvable:$true] %s880_s23 }
  0x81   :  { %301 = vmatprep.subr.bf16.mxu1 %v1058_v14  ;;  %v1122_v5 = vld [vmem:[#allocation10 + $0x18] sm:$0xff]   ;;  %v199_v9 = vld [vmem:[%s1520_s4] sm:$0x3]  ;;  %v1123_v23 = vld [vmem:[#allocation10 + $0x60] sm:$0xff]   ;;  %p1288_p7 = scmp.lt.s32.totalorder %s881_s23, %s881_s23 }
  0x82   :  { %547 = vmatpush1.bf16.msra.mxu0 %v1076_v28  ;;  %v204_v11 = vrot.slane %v199_v9, %v203_v8  ;;  %v208_v12 = vrot.slane %v199_v9, %v207_v10  ;;  %v1124_v24 = vld [vmem:[#allocation10 + $0x20] sm:$0xff]   ;;  %v1125_v25 = vld [vmem:[#allocation10 + $0x68] sm:$0xff]   ;;  %v1127_v27 = vld [vmem:[#allocation10 + $0x70] sm:$0xff]  }
  0x83   :  { %548 = vmatprep.subr.bf16.mxu0 %v1081_v29  ;;  %v1126_v26 = vld [vmem:[#allocation10 + $0x28] sm:$0xff]   ;;  %v1128_v28 = vld [vmem:[#allocation10 + $0x30] sm:$0xff]   ;;  %v1129_v29 = vld [vmem:[#allocation10 + $0x78] sm:$0xff]  }
  0x84   :  { %302 = vmatpush1.bf16.msra.mxu1 %v1060_v15 }
  0x85   :  { %303 = vmatprep.subr.bf16.mxu1 %v1061_v16 }
  0x86   :  { %549 = vmatpush1.bf16.msra.mxu0 %v1079_v30  ;;  %v1130_v30 = vld [vmem:[#allocation10 + $0x38] sm:$0xff]  }
  0x87   :  { %550 = vmatprep.subr.bf16.mxu0 %v1084_v31  ;;  %v368_v31 = vld [vmem:[%s1522_s6] sm:$0x3] }
  0x88   :  { %304 = vmatpush1.bf16.msra.mxu1 %v1063_v17 }
  0x89   :  { %305 = vmatprep.subr.bf16.mxu1 %v1064_v18 }
  0x8a   :  { %551 = vmatpush1.bf16.msra.mxu0 %v1082_v32  ;;  %v373_v32 = vrot.slane %v368_v31, %v203_v8 }
  0x8b   :  { %552 = vmatprep.subr.bf16.mxu0 %v1087_v33  ;;  %v377_v33 = vrot.slane %v368_v31, %v207_v10 }
  0x8c   :  { %306 = vmatpush1.bf16.msra.mxu1 %v1066_v19 }
  0x8d   :  { %971 = vmatprep.subr.bf16.mxu1 %v1115_v61 }
  0x8e   :  { %553 = vmatpush1.bf16.msra.mxu0 %v1085_v34 }
  0x8f   :  { %554 = vmatprep.subr.bf16.mxu0 %v1090_v35 }
  0x92   :  { %555 = vmatpush1.bf16.msra.mxu0 %v1088_v36 }
  0x93   :  { %556 = vmatprep.subr.bf16.mxu0 %v1093_v37 }
  0x96   :  { %557 = vmatpush1.bf16.msra.mxu0 %v1091_v38 }
  0x97   :  { %558 = vmatprep.subr.bf16.mxu0 %v1096_v39 }
  0x9a   :  { %559 = vmatpush1.bf16.msra.mxu0 %v1094_v40 }
  0x9b   :  { %560 = vmatprep.subr.bf16.mxu0 %v1099_v41 }
  0x9e   :  { %561 = vmatpush1.bf16.msra.mxu0 %v1097_v42 }
  0x9f   :  { %562 = vmatprep.subr.bf16.mxu0 %v1102_v43  ;;  %v1131_v43 = vld [vmem:[#allocation11] sm:$0xff]  }
  0xa2   :  { %563 = vmatpush1.bf16.msra.mxu0 %v1100_v44 }
  0xa3   :  { %564 = vmatprep.subr.bf16.mxu0 %v1105_v53  ;;  %v943_v53 = vld [vmem:[%s1524_s8] ss:$0 sm:$0xff]  ;;  %s1283_s8 = scalar_lea.vmem %s881_s23, 128 }
  0xa4   :  { %p1284_p6 = scmp.ne.s32.totalorder %s881_s23, %s1283_s8  ;;  %p1289_p8 = scmp.lt.s32.totalorder %s1283_s8, %s1283_s8 }
  0xa6   :  { %565 = vmatpush1.bf16.msra.mxu0 %v1103_v54  ;;  %p1290_p9 = por %p1289_p8, %p1288_p7 }
  0xa7   :  { %566 = vmatprep.subr.bf16.mxu0 %v1108_v55 }
  0xa8   :  { %p1291_p10 = pnand %p1290_p9, %p1284_p6 }
  0xaa   :  { %567 = vmatpush1.bf16.msra.mxu0 %v1106_v56 }
  0xab   :  { %568 = vmatprep.subr.bf16.mxu0 %v1111_v57 }
  0xae   :  { %569 = vmatpush1.bf16.msra.mxu0 %v1109_v58 }
  0xaf   :  { %570 = vmatprep.subr.bf16.mxu0 %v1114_v59 }
  0xb2   :  { %571 = vmatpush1.bf16.msra.mxu0 %v1112_v60 }
 0x145   :  { %v175_v46 = vpop.f32.mrb[0].mxu0 }
 0x146   :  { %v176_v47 = vadd.f32 %v892_v45, %v175_v46  ;;  %v1006_v48 = vpop.f32.mrb[1].mxu0  ;;  %v1132_v45 = vld [vmem:[#allocation11 + $0x8] sm:$0xff]   ;;  %v1133_v46 = vld [vmem:[#allocation11 + $0x10] sm:$0xff]  }
 0x147   :  { %v178_v49 = vpop.f32.mrb[2].mxu0  ;;  %v1135_v48 = vld [vmem:[#allocation11 + $0x20] sm:$0xff]  }
 0x148   :  { %1139 = vtanh.f32 %v176_v47  ;;  %v1007_v50 = vpop.f32.mrb[3].mxu0  ;;  %v1134_v47 = vld [vmem:[#allocation11 + $0x18] sm:$0xff]   ;;  %v1136_v49 = vld [vmem:[#allocation11 + $0x28] sm:$0xff]  }
 0x149   :  { %v1137_v50 = vld [vmem:[#allocation11 + $0x30] sm:$0xff]  }
 0x152   :  { %v1140_v51 = vpop.eup %1139 }
 0x153   :  { %v182_v52 = vpack.c.bf16 %v1140_v51, %v1140_v51  ;;  %v1138_v51 = vld [vmem:[#allocation11 + $0x38] sm:$0xff]  }
 0x155   :  { %324 = vmatmul.mubr.bf16.vlgmr.msra.gmra.mrb[0].mxu1 %v182_v52 }
 0x156   :  { %972 = vmatpush3.bf16.msra.mxu1 %v1116_v62 }
 0x157   :  { %973 = vmatprep.subr.bf16.mxu1 %v1117_v63 }
 0x15a   :  { %974 = vmatpush3.bf16.msra.mxu1 %v1118_v1 }
 0x15b   :  { %975 = vmatprep.subr.bf16.mxu1 %v1119_v2 }
 0x15e   :  { %976 = vmatpush3.bf16.msra.mxu1 %v1120_v3 }
 0x15f   :  { %977 = vmatprep.subr.bf16.mxu1 %v1121_v4 }
 0x162   :  { %978 = vmatpush3.bf16.msra.mxu1 %v1122_v5 }
 0x163   :  { %979 = vmatprep.subr.bf16.mxu1 %v1123_v23 }
 0x166   :  { %980 = vmatpush3.bf16.msra.mxu1 %v1124_v24 }
 0x167   :  { %981 = vmatprep.subr.bf16.mxu1 %v1125_v25 }
 0x16a   :  { %982 = vmatpush3.bf16.msra.mxu1 %v1126_v26 }
 0x16b   :  { %983 = vmatprep.subr.bf16.mxu1 %v1127_v27 }
 0x16e   :  { %984 = vmatpush3.bf16.msra.mxu1 %v1128_v28 }
 0x16f   :  { %985 = vmatprep.subr.bf16.mxu1 %v1129_v29 }
 0x172   :  { %986 = vmatpush3.bf16.msra.mxu1 %v1130_v30 }
 0x173   :  { %1008 = vmatprep.subr.bf16.mxu1 %v1325_v0 }
 0x228   :  { %v325_v13 = vpop.f32.mrb[0].mxu1 }
 0x229   :  { %v326_v14 = vadd.f32 %v325_v13, %v204_v11  ;;  %v327_v15 = vpop.f32.mrb[1].mxu1 }
 0x22a   :  { %v328_v16 = vadd.f32 %v327_v15, %v208_v12  ;;  %v329_v17 = vpop.f32.mrb[2].mxu1 }
 0x22b   :  { %1141 = vtanh.f32 %v326_v14  ;;  %v330_v18 = vpop.f32.mrb[3].mxu1 }
 0x22c   :  { %1143 = vtanh.f32 %v328_v16 }
 0x235   :  { %v1142_v19 = vpop.eup %1141 }
 0x236   :  { %v1144_v20 = vpop.eup %1143  ;;  %v334_v22 = vpack.c.bf16 %v1142_v19, %v1142_v19 }
 0x237   :  { %v335_v21 = vpack.c.bf16 %v1144_v20, %v1144_v20 }
 0x239   :  { %572 = vmatprep.mubr.bf16.mxu0 %v335_v21 }
 0x23a   :  { %573 = vmatmul.mubr.bf16.vlgmr.msra.gmra.mrb[4].mxu0 %v334_v22 }
 0x30d   :  { %v574_v34 = vpop.f32.mrb[4].mxu0 }
 0x30e   :  { %v575_v35 = vadd.f32 %v574_v34, %v373_v32  ;;  %v576_v36 = vpop.f32.mrb[5].mxu0 }
 0x30f   :  { %v577_v37 = vadd.f32 %v576_v36, %v377_v33  ;;  %v578_v38 = vpop.f32.mrb[6].mxu0 }
 0x310   :  { %1145 = vtanh.f32 %v575_v35  ;;  %v579_v39 = vpop.f32.mrb[7].mxu0 }
 0x311   :  { %1147 = vtanh.f32 %v577_v37 }
 0x31a   :  { %v1146_v40 = vpop.eup %1145 }
 0x31b   :  { %v1148_v41 = vpop.eup %1147  ;;  %v583_v44 = vpack.c.bf16 %v1146_v40, %v1146_v40 }
 0x31c   :  { %v584_v42 = vpack.c.bf16 %v1148_v41, %v1148_v41 }
 0x31e   :  { %752 = vmatprep.mubr.bf16.mxu1 %v584_v42 }
 0x31f   :  { %753 = vmatmul.mubr.bf16.vlgmr.msra.gmra.mrb[4].mxu1 %v583_v44 }
 0x320   :  { %1009 = vmatpush3.bf16.msra.mxu1 %v1131_v43  ;;  %1024 = vmatprep.mubr.msk.bf16.mxu1 %vm1326_vm0, %v1325_v0 }
 0x321   :  { %1010 = vmatprep.subr.bf16.mxu1 %v1325_v0 }
 0x324   :  { %1011 = vmatpush3.bf16.msra.mxu1 %v1132_v45 }
 0x325   :  { %1012 = vmatprep.subr.bf16.mxu1 %v1325_v0 }
 0x328   :  { %1013 = vmatpush3.bf16.msra.mxu1 %v1133_v46 }
 0x329   :  { %1014 = vmatprep.subr.bf16.mxu1 %v1325_v0 }
 0x32c   :  { %1015 = vmatpush3.bf16.msra.mxu1 %v1134_v47 }
 0x32d   :  { %1016 = vmatprep.subr.bf16.mxu1 %v1325_v0 }
 0x330   :  { %1017 = vmatpush3.bf16.msra.mxu1 %v1135_v48 }
 0x331   :  { %1018 = vmatprep.subr.bf16.mxu1 %v1325_v0 }
 0x334   :  { %1019 = vmatpush3.bf16.msra.mxu1 %v1136_v49 }
 0x335   :  { %1020 = vmatprep.subr.bf16.mxu1 %v1325_v0 }
 0x338   :  { %1021 = vmatpush3.bf16.msra.mxu1 %v1137_v50 }
 0x339   :  { %1022 = vmatprep.subr.bf16.mxu1 %v1325_v0  ;;  %v960_v0 = vld [vmem:[%s1526_s10] ss:$0 sm:$0xff] }
 0x33c   :  { %1023 = vmatpush3.bf16.msra.mxu1 %v1138_v51 }
 0x3f2   :  { %v987_v52 = vpop.f32.mrb[4].mxu1 }
 0x3f3   :  { %v988_v54 = vpop.f32.mrb[5].mxu1 }
 0x3f4   :  { %v989_v55 = vadd.f32 %v988_v54, %v987_v52  ;;  %v990_v56 = vpop.f32.mrb[6].mxu1 }
 0x3f5   :  { %v991_v57 = vpop.f32.mrb[7].mxu1 }
 0x3f6   :  { %v755_v58 = vadd.f32 %v989_v55, %v943_v53 }
 0x3f8   :  { %1149 = vtanh.f32 %v755_v58 }
 0x402   :  { %v1150_v59 = vpop.eup %1149 }
 0x403   :  { %v761_v60 = vpack.c.bf16 %v1150_v59, %v1150_v59 }
 0x405   :  { %1025 = vmatmul.mubr.bf16.vlgmr.msra.gmra.mrb[8].mxu1 %v761_v60 }
 0x4d8   :  { %v867_v61 = vpop.f32.mrb[8].mxu1 }
 0x4d9   :  { %v868_v62 = vadd.f32 %v960_v0, %v867_v61  ;;  %v1026_v63 = vpop.f32.mrb[9].mxu1 }
 0x4da   :  { %v870_v1 = vpop.f32.mrb[10].mxu1 }
 0x4db   :  { %873 = vst [vmem:[#allocation13] sm:$0xff] %v868_v62  ;;  %v1027_v2 = vpop.f32.mrb[11].mxu1 }
 0x4dc   :  { %1294 = shalt.err (!%p1291_p10)
}
 0x4dd   :  { %s1295_s10 = scalar_lea.hbm %s1527_s11, 128 }
 0x4de   :  { %p1296_p11 = scmp.ne.s32.totalorder %s1527_s11, %s1295_s10  ;;  %p1299_p12 = scmp.lt.u32.totalorder %s1295_s10, %s1527_s11 }
 0x4e0   :  { %p1301_p13 = pnand %p1299_p12, %p1296_p11 }
 0x4e2   :  { %1304 = shalt.err (!%p1301_p13)
}
 0x4e3   :  { %883 = dma.vmem_to_hbm [thread:$0]  %s881_s23, 128, %s1527_s11, [#allocation4]  }
 0x4e4   :  { %1313 = dma.done.wait [#allocation4], 128  }
 0x4e5   :  { %1314 = vsyncadd [#allocation4], 4294967168 }
 0x4e6   :  { %887 = vsyncpa [#allocation3], 1 }
 0x4e7   :  { %888 = vsyncpa [#allocation6], 1 }
 0x4e8   :  { %889 = vsyncpa [#allocation9], 1 }
 0x4e9   :  { %890 = vsyncpa [#allocation12], 1 }
 0x4ea   :  { %891 = vsyncpa [#allocation4], 1 }

</bundles_post_ra>
